<compile_context>
chip_gen: v6e
topology: v6e:2x2x1
jax: 0.10.0
libtpu: 0.0.40
codegen_flags: <defaults>
</compile_context>

<pallas_src>
import math
import functools

import jax
import jax.numpy as jnp
from jax.experimental import pallas as pl
from jax.experimental.pallas import tpu as pltpu


def _rbf_initial_params(num_rbf: int, rbound_upper: float):
    """Deterministic parameter init, identical math to the PyTorch module."""
    start_value = math.exp(-rbound_upper)
    end_value = math.exp(-0.0)  # rbound_lower = 0
    means = jnp.linspace(start_value, end_value, num_rbf, dtype=jnp.float32)
    beta_val = (2.0 / num_rbf * (end_value - start_value)) ** (-2)
    betas = jnp.full((num_rbf,), beta_val, dtype=jnp.float32)
    return means, betas


def _rbf_kernel(dist_ref, means_ref, betas_ref, out_ref, *, rbound_upper: float):
    # dist_ref:  (1, TE)        float32   -- edges on the lane axis (lane-dense)
    # means_ref: (num_rbf, 1)   float32
    # betas_ref: (num_rbf, 1)   float32
    # out_ref:   (num_rbf, TE)  float32   -- lane-dense, unmasked stores
    d = dist_ref[...]                                          # (1, TE)

    # Per-edge work on full-width row vregs (EUP cos/exp at full lane occupancy).
    rbounds = 0.5 * (jnp.cos(d * (math.pi / rbound_upper)) + 1.0)
    rbounds = jnp.where(d < rbound_upper, rbounds, 0.0)        # (1, TE)
    exp_neg_d = jnp.exp(-d)                                    # (1, TE)

    # Broadcast (1, TE) against (num_rbf, 1) -> (num_rbf, TE); sublane = rbf axis.
    diff = exp_neg_d - means_ref[...]                          # (num_rbf, TE)
    out_ref[...] = (rbounds * jnp.exp(-betas_ref[...] * jnp.square(diff))
                    ).astype(out_ref.dtype)


def rbf_emb(dist, means, betas, rbound_upper: float, *,
            tile_e: int = 2048, out_dtype=jnp.float32):
    """dist: any shape, float32. Returns dist.shape + (num_rbf,) in out_dtype."""
    num_rbf = means.shape[0]
    orig_shape = dist.shape
    flat = dist.reshape(-1).astype(jnp.float32)
    e = flat.shape[0]

    lane = 128
    # Shrink the tile for small inputs; always keep it a multiple of 128 lanes.
    tile_e = max(lane, min(tile_e, pl.cdiv(e, lane) * lane))
    e_pad = pl.cdiv(e, tile_e) * tile_e
    if e_pad != e:
        # Padded entries (d=0) produce finite values and are sliced away below.
        flat = jnp.pad(flat, (0, e_pad - e))

    dist2d = flat.reshape(1, e_pad)                       # edges -> lanes
    means2d = means.reshape(num_rbf, 1).astype(jnp.float32)
    betas2d = betas.reshape(num_rbf, 1).astype(jnp.float32)

    kernel = functools.partial(_rbf_kernel, rbound_upper=float(rbound_upper))

    bytes_out = e_pad * num_rbf * jnp.dtype(out_dtype).itemsize
    cost = pl.CostEstimate(
        flops=6 * e_pad * num_rbf,
        transcendentals=e_pad * (num_rbf + 2),
        bytes_accessed=4 * (e_pad + 2 * num_rbf) + bytes_out,
    )

    out = pl.pallas_call(
        kernel,
        out_shape=jax.ShapeDtypeStruct((num_rbf, e_pad), out_dtype),
        grid_spec=pltpu.PrefetchScalarGridSpec(
            num_scalar_prefetch=0,
            grid=(e_pad // tile_e,),
            in_specs=[
                pl.BlockSpec((1, tile_e), lambda i: (0, i)),
                pl.BlockSpec((num_rbf, 1), lambda i: (0, 0)),
                pl.BlockSpec((num_rbf, 1), lambda i: (0, 0)),
            ],
            out_specs=pl.BlockSpec((num_rbf, tile_e), lambda i: (0, i)),
        ),
        compiler_params=pltpu.CompilerParams(
            dimension_semantics=("parallel",)),
        cost_estimate=cost,
    )(dist2d, means2d, betas2d)

    # Slice + transpose back to the public (..., num_rbf) layout in one fused op.
    out = out[:, :e].T
    return out.reshape(*orig_shape, num_rbf)


def rbf_emb_reference(dist, means, betas, rbound_upper: float):
    """Pure-JAX reference mirroring the PyTorch forward."""
    d = dist[..., None].astype(jnp.float32)
    rbounds = 0.5 * (jnp.cos(d * math.pi / rbound_upper) + 1.0)
    rbounds = rbounds * (d < rbound_upper).astype(jnp.float32)
    return rbounds * jnp.exp(-betas * jnp.square(jnp.exp(-d) - means))


if __name__ == "__main__":
    num_rbf = 32
    rbound_upper = 5.0
    n_edges = 100  # deliberately not a multiple of 128 -> exercises padding path

    means, betas = _rbf_initial_params(num_rbf, rbound_upper)

    key = jax.random.PRNGKey(0)
    # distances in [0, 1.2*rbound_upper) so some exceed the cutoff
    dist = jax.random.uniform(key, (n_edges,), dtype=jnp.float32,
                              minval=0.0, maxval=1.2 * rbound_upper)

    out = rbf_emb(dist, means, betas, rbound_upper)
    out = jax.block_until_ready(out)

    ref = rbf_emb_reference(dist, means, betas, rbound_upper)
    assert out.shape == (n_edges, num_rbf), out.shape
    assert jnp.allclose(out, ref, atol=1e-5, rtol=1e-5), "mismatch vs reference"

    # Multi-dim input (batch of edge lists) to exercise reshape handling.
    dist_2d = jax.random.uniform(jax.random.PRNGKey(1), (2, 8), dtype=jnp.float32,
                                 minval=0.0, maxval=1.2 * rbound_upper)
    out2 = jax.block_until_ready(rbf_emb(dist_2d, means, betas, rbound_upper))
    ref2 = rbf_emb_reference(dist_2d, means, betas, rbound_upper)
    assert out2.shape == (2, 8, num_rbf), out2.shape
    assert jnp.allclose(out2, ref2, atol=1e-5, rtol=1e-5), "mismatch vs reference (2d)"

    print("KERNEL_OK")
</pallas_src>

<mosaic_0001>
module attributes {stable_mosaic.version = 11 : i64} {
  func.func @_rbf_kernel(%arg0: i32, %arg1: memref<1x128xf32, #tpu.memory_space<vmem>>, %arg2: memref<32x1xf32, #tpu.memory_space<vmem>>, %arg3: memref<32x1xf32, #tpu.memory_space<vmem>>, %arg4: memref<32x128xf32, #tpu.memory_space<vmem>>) attributes {dimension_semantics = [#tpu.dimension_semantics<parallel>], iteration_bounds = array<i64: 1>, scalar_prefetch = 0 : i64, scratch_operands = 0 : i64, tpu.core_type = #tpu.core_type<tc>, window_params = [{transform_indices = @transform_0, window_bounds = array<i64: 1, 128>}, {pipeline_mode = #tpu.pipeline_mode<synchronous>, transform_indices = @transform_1, window_bounds = array<i64: 32, 1>}, {pipeline_mode = #tpu.pipeline_mode<synchronous>, transform_indices = @transform_2, window_bounds = array<i64: 32, 1>}, {transform_indices = @transform_3, window_bounds = array<i64: 32, 128>}]} {
    %c0 = arith.constant 0 : index
    %c0_0 = arith.constant 0 : index
    %0 = vector.load %arg1[%c0, %c0_0] : memref<1x128xf32, #tpu.memory_space<vmem>>, vector<1x128xf32>
    %cst = arith.constant 0.628318548 : f32
    %1 = vector.broadcast %cst : f32 to vector<1x128xf32>
    %2 = arith.mulf %0, %1 : vector<1x128xf32>
    %3 = math.cos %2 : vector<1x128xf32>
    %cst_1 = arith.constant 1.000000e+00 : f32
    %4 = vector.broadcast %cst_1 : f32 to vector<1x128xf32>
    %5 = arith.addf %3, %4 : vector<1x128xf32>
    %cst_2 = arith.constant 5.000000e-01 : f32
    %6 = vector.broadcast %cst_2 : f32 to vector<1x128xf32>
    %7 = arith.mulf %6, %5 : vector<1x128xf32>
    %cst_3 = arith.constant 5.000000e+00 : f32
    %8 = vector.broadcast %cst_3 : f32 to vector<1x128xf32>
    %9 = arith.cmpf olt, %0, %8 : vector<1x128xf32>
    %cst_4 = arith.constant 0.000000e+00 : f32
    %10 = vector.broadcast %cst_4 : f32 to vector<1x128xf32>
    %11 = arith.select %9, %7, %10 : vector<1x128xi1>, vector<1x128xf32>
    %cst_5 = arith.constant 0.000000e+00 : f32
    %12 = vector.broadcast %cst_5 : f32 to vector<1x128xf32>
    %13 = arith.subf %12, %0 : vector<1x128xf32>
    %14 = math.exp %13 : vector<1x128xf32>
    %c0_6 = arith.constant 0 : index
    %c0_7 = arith.constant 0 : index
    %15 = vector.load %arg2[%c0_6, %c0_7] : memref<32x1xf32, #tpu.memory_space<vmem>>, vector<32x1xf32>
    %16 = vector.broadcast %14 : vector<1x128xf32> to vector<32x128xf32>
    %17 = vector.broadcast %15 : vector<32x1xf32> to vector<32x128xf32>
    %18 = arith.subf %16, %17 : vector<32x128xf32>
    %c0_8 = arith.constant 0 : index
    %c0_9 = arith.constant 0 : index
    %19 = vector.load %arg3[%c0_8, %c0_9] : memref<32x1xf32, #tpu.memory_space<vmem>>, vector<32x1xf32>
    %cst_10 = arith.constant 0.000000e+00 : f32
    %20 = vector.broadcast %cst_10 : f32 to vector<32x1xf32>
    %21 = arith.subf %20, %19 : vector<32x1xf32>
    %22 = arith.mulf %18, %18 : vector<32x128xf32>
    %23 = vector.broadcast %21 : vector<32x1xf32> to vector<32x128xf32>
    %24 = arith.mulf %23, %22 : vector<32x128xf32>
    %25 = math.exp %24 : vector<32x128xf32>
    %26 = vector.broadcast %11 : vector<1x128xf32> to vector<32x128xf32>
    %27 = arith.mulf %26, %25 : vector<32x128xf32>
    %c0_11 = arith.constant 0 : index
    %c0_12 = arith.constant 0 : index
    %28 = vector.load %arg4[%c0_11, %c0_12] : memref<32x128xf32, #tpu.memory_space<vmem>>, vector<32x128xf32>
    tpu.vector_store %arg4[%c0_11, %c0_12], %27 {strides = array<i32>} : memref<32x128xf32, #tpu.memory_space<vmem>>, vector<32x128xf32>,
    return
  }
  func.func @transform_0(%arg0: i32) -> (i32, i32) {
    %c0_i32 = arith.constant 0 : i32
    %c0_i32_0 = arith.constant 0 : i32
    return %c0_i32, %arg0 : i32, i32
  }
  func.func @transform_1(%arg0: i32) -> (i32, i32) {
    %c0_i32 = arith.constant 0 : i32
    %c0_i32_0 = arith.constant 0 : i32
    %c0_i32_1 = arith.constant 0 : i32
    return %c0_i32, %c0_i32_0 : i32, i32
  }
  func.func @transform_2(%arg0: i32) -> (i32, i32) {
    %c0_i32 = arith.constant 0 : i32
    %c0_i32_0 = arith.constant 0 : i32
    %c0_i32_1 = arith.constant 0 : i32
    return %c0_i32, %c0_i32_0 : i32, i32
  }
  func.func @transform_3(%arg0: i32) -> (i32, i32) {
    %c0_i32 = arith.constant 0 : i32
    %c0_i32_0 = arith.constant 0 : i32
    return %c0_i32, %arg0 : i32, i32
  }
}

</mosaic_0001>

<bundles_post_ra>
// kernel: tpu_custom_call.1
= control target key start
LH: loop header
LB: loop body
LE: loop exit
PB: predicated region body
PF: predicated region fallthrough
CT: control target
= control target key end

     0   :  { %v291_v2 = vmov 0   ;;  %s377_s0 = inlined_call_operand.vmem [shape: f32[1,128], index: 0, kind: input, shape index: {}]   ;;  %s378_s1 = inlined_call_operand.vmem [shape: f32[32,1], index: 1, kind: input, shape index: {}]   ;;  %s379_s2 = inlined_call_operand.vmem [shape: f32[32,1], index: 2, kind: input, shape index: {}]   ;;  %s380_s3 = inlined_call_operand.hbm [shape: f32[32,128], index: 3, kind: output, shape index: {}]  }
   0x1   :  { %v129_v0 = vld [vmem:[%s378_s1 + $0x10] sm:$0xff]  ;;  %v127_v1 = vld [vmem:[%s378_s1] sm:$0xff]  ;;  %254 = vset.pattern.permute.xlu1 %v291_v2  ;;  %253 = vset.pattern.permute.xlu0 %v291_v2  ;;  %v130_v3 = vld [vmem:[%s378_s1 + $0x18] sm:$0xff] }
   0x2   :  { %149 = vperm.xlu1 %254, %v129_v0   ;;  %139 = vperm.xlu0 %253, %v127_v1   ;;  %v128_v4 = vld [vmem:[%s378_s1 + $0x8] sm:$0xff]  ;;  %v161_v6 = vld [vmem:[%s379_s2] sm:$0xff] }
   0x3   :  { %v162_v5 = vld [vmem:[%s379_s2 + $0x8] sm:$0xff]  ;;  %v342_v7 = vld [vmem:[%s377_s0] sm:$0x1]  ;;  %v165_v10 = vsub.f32 0.0, %v161_v6 }
   0x4   :  { %v345_v8 = vmul.f32 0.62831855, %v342_v7  ;;  %v166_v9 = vsub.f32 0.0, %v162_v5 }
   0x6   :  { %154 = vperm.xlu1 %254, %v130_v3   ;;  %144 = vperm.xlu0 %253, %v128_v4   ;;  %v20_v11 = vand.u32 2139095040, %v345_v8 }
   0x7   :  { %8 = vsyncpa [#allocation3], 0  ;;  %v164_v12 = vld [vmem:[%s379_s2 + $0x18] sm:$0xff]  ;;  %v163_v13 = vld [vmem:[%s379_s2 + $0x10] sm:$0xff]  ;;  %v17_v15 = vand.u32 2147483647, %v345_v8  ;;  %vm109_vm12 = vweird.f32 %v345_v8 }
   0x8   :  { %v21_v14 = vshrl.u32 %v20_v11, 23  ;;  %v168_v16 = vsub.f32 0.0, %v164_v12  ;;  %v167_v17 = vsub.f32 0.0, %v163_v13  ;;  %v292_v26 = vmov 683565275   ;;  %s298_s0 = smov [#allocation2]  }
   0x9   :  { %v24_v20 = vand.u32 8388607, %v17_v15  ;;  %v293_v28 = vmov 2475754826   ;;  %v294_v30 = vmov 2131351028  }
   0xa   :  { %180 = vperm.xlu1 %254, %v166_v9   ;;  %175 = vperm.xlu0 %253, %v165_v10   ;;  %v235_v18 = vadd.s32 4294967169, %v21_v14  ;;  %v295_v32 = vmov 2102212464   ;;  %v296_v34 = vmov 920167782   ;;  %vm19_vm7 = vcmp.lt.s32.totalorder %v345_v8, 0 }
   0xb   :  { %v25_v23 = vor.u32 8388608, %v24_v20  ;;  %v297_v41 = vmov 1326507024   ;;  %vm18_vm8 = vcmp.le.f32.partialorder %v17_v15, 0.7853982  ;;  %vm122_vm13 = vcmp.lt.f32.partialorder %v342_v7, 5.0 }
   0xc   :  { %v27_v19 = vadd.s32 1, %v235_v18  ;;  %s224_s2 = sshll.u32 %s298_s0, 4  ;;  %s225_s2 = int_to_ptr.vmem [resolvable:$true] %s224_s2 }
   0xd   :  { %v65_v43 = vshll.u32 %v25_v23, 8  ;;  %s269_s29 = scalar_lea.vmem %s225_s2, 512  ;;  %p274_p1 = scmp.lt.s32.totalorder %s225_s2, %s225_s2 }
   0xe   :  { %190 = vperm.xlu1 %254, %v168_v16   ;;  %185 = vperm.xlu0 %253, %v167_v17   ;;  %vm28_vm0 = vcmp.gt.s32.totalorder %v27_v19, 0  ;;  %p270_p0 = scmp.ne.s32.totalorder %s225_s2, %s269_s29  ;;  %p275_p2 = scmp.lt.s32.totalorder %s269_s29, %s269_s29 }
   0xf   :  { %v29_v21 = vsel %vm28_vm0, %v27_v19, 0 }
  0x10   :  { %v31_v22 = vand.u32 31, %v29_v21  ;;  %v30_v24 = vshrl.u32 %v29_v21, 5  ;;  %p276_p3 = por %p275_p2, %p274_p1 }
  0x12   :  { %v32_v25 = vsub.s32 32, %v31_v22  ;;  %v34_v27 = vshll.u32 %v292_v26, %v31_v22  ;;  %v37_v29 = vshll.u32 %v293_v28, %v31_v22  ;;  %v40_v31 = vshll.u32 %v294_v30, %v31_v22  ;;  %p277_p4 = pnand %p276_p3, %p270_p0 }
  0x13   :  { %v43_v33 = vshll.u32 %v295_v32, %v31_v22  ;;  %v46_v35 = vshll.u32 %v296_v34, %v31_v22  ;;  %vm49_vm1 = vcmp.lt.s32.totalorder %v30_v24, 1  ;;  %vm52_vm2 = vcmp.lt.s32.totalorder %v30_v24, 4 }
  0x14   :  { %v33_v36 = vshrl.u32 %v292_v26, %v32_v25  ;;  %v35_v37 = vshrl.u32 %v293_v28, %v32_v25  ;;  %v38_v38 = vshrl.u32 %v294_v30, %v32_v25  ;;  %v41_v39 = vshrl.u32 %v295_v32, %v32_v25 }
  0x15   :  { %v44_v40 = vshrl.u32 %v296_v34, %v32_v25  ;;  %v47_v42 = vshrl.u32 %v297_v41, %v32_v25  ;;  %vm50_vm3 = vcmp.lt.s32.totalorder %v30_v24, 2  ;;  %vm51_vm4 = vcmp.lt.s32.totalorder %v30_v24, 3 }
  0x16   :  { %v36_v44 = vor.u32 %v35_v37, %v34_v27  ;;  %v39_v45 = vor.u32 %v38_v38, %v37_v29  ;;  %v42_v46 = vor.u32 %v41_v39, %v40_v31 }
  0x17   :  { %v45_v47 = vor.u32 %v44_v40, %v43_v33  ;;  %v48_v48 = vor.u32 %v47_v42, %v46_v35 }
  0x18   :  { %v53_v49 = vsel %vm49_vm1, %v33_v36, %v36_v44  ;;  %v54_v50 = vsel %vm52_vm2, %v42_v46, 2102212464  ;;  %v57_v51 = vsel %vm49_vm1, %v36_v44, %v39_v45  ;;  %v61_v52 = vsel %vm49_vm1, %v39_v45, %v42_v46 }
  0x19   :  { %v55_v53 = vsel %vm51_vm4, %v39_v45, %v54_v50  ;;  %v58_v54 = vsel %vm52_vm2, %v45_v47, 920167782  ;;  %v62_v55 = vsel %vm52_vm2, %v48_v48, 1326507024  ;;  %v132_v48 = vlaneseq }
  0x1a   :  { %v59_v56 = vsel %vm51_vm4, %v42_v46, %v58_v54  ;;  %v63_v57 = vsel %vm51_vm4, %v45_v47, %v62_v55  ;;  %v56_v58 = vsel %vm50_vm3, %v53_v49, %v55_v53  ;;  %v124_v46 = vsub.f32 0.0, %v342_v7 }
  0x1b   :  { %v60_v59 = vsel %vm50_vm3, %v57_v51, %v59_v56  ;;  %v64_v60 = vsel %vm50_vm3, %v61_v52, %v63_v57  ;;  %v72_v1 = vmul.u32 %v65_v43, %v56_v58  ;;  %v133_v49 = vshrl.u32 %v132_v48, 7 }
  0x1c   :  { %v357_v61 = vmul.u32.u64.low %v65_v43, %v64_v60  ;;  %v358_v62 = vmul.u32.u64.high %v65_v43, %v64_v60, %v357_v61  ;;  %v360_v63 = vmul.u32.u64.low %v65_v43, %v60_v59  ;;  %v361_v0 = vmul.u32.u64.high %v65_v43, %v60_v59, %v360_v63 }
  0x1d   :  { %v125_v47 = vmul.f32 1.442695, %v124_v46  ;;  %v134_v50 = vsub.s32 0, %v133_v49 }
  0x1e   :  { %vm74_vm5 = vc.u32 %v358_v62, %v360_v63  ;;  %v75_v2 = vadd.s32 1, %v361_v0  ;;  %v73_v16 = vadd.s32 %v360_v63, %v358_v62 }
  0x20   :  { %v76_v3 = vsel %vm74_vm5, %v75_v2, %v361_v0 }
  0x21   :  { %v77_v4 = vadd.s32 %v76_v3, %v72_v1 }
  0x23   :  { %v78_v5 = vadd.s32 536870912, %v77_v4 }
  0x25   :  { %v79_v6 = vshrl.u32 %v78_v5, 30 }
  0x27   :  { %v80_v9 = vshll.u32 %v79_v6, 30  ;;  %v103_v31 = vsub.s32 4, %v79_v6 }
  0x29   :  { %v81_v10 = vsub.s32 %v77_v4, %v80_v9  ;;  %v104_v33 = vsel %vm19_vm7, %v103_v31, %v79_v6 }
  0x2a   :  { %v106_v34 = vsel %vm18_vm8, 0, %v104_v33 }
  0x2b   :  { %v83_v11 = vsub.s32 0, %v81_v10  ;;  %v110_v35 = vand.u32 3, %v106_v34 }
  0x2d   :  { %v236_v12 = vmin.u32 %v83_v11, %v81_v10  ;;  %vm115_vm9 = vcmp.eq.s32.totalorder %v110_v35, 2  ;;  %vm112_vm10 = vcmp.eq.s32.totalorder %v110_v35, 0  ;;  %vm111_vm11 = vcmp.lt.s32.totalorder %v110_v35, 2 }
  0x2f   :  { %v85_v13 = vclz %v236_v12 }
  0x31   :  { %v237_v14 = vadd.s32 4294967294, %v85_v13 }
  0x33   :  { %vm238_vm6 = vcmp.lt.s32.totalorder %v237_v14, 0 }
  0x34   :  { %v88_v17 = vsel %vm238_vm6, 0, %v237_v14 }
  0x35   :  { %v89_v18 = vsub.s32 32, %v88_v17  ;;  %v90_v19 = vshll.u32 %v81_v10, %v88_v17  ;;  %v93_v20 = vsub.s32 4294967266, %v88_v17 }
  0x37   :  { %v91_v21 = vshrl.u32 %v73_v16, %v89_v18  ;;  %v94_v22 = vadd.s32 127, %v93_v20 }
  0x39   :  { %v92_v23 = vor.u32 %v91_v21, %v90_v19  ;;  %v95_v24 = vshll.u32 %v94_v22, 23 }
  0x3b   :  { %v96_v25 = vor.u32 4788187, %v95_v24  ;;  %v99_v26 = vcvt.s32.f32 %v92_v23 }
  0x3d   :  { %v97_v27 = vand.u32 2147483647, %v96_v25 }
  0x3f   :  { %v100_v28 = vmul.f32 %v99_v26, %v97_v27 }
  0x41   :  { %v101_v29 = vxor.u32 2147483648, %v100_v28 }
  0x43   :  { %v102_v30 = vsel %vm19_vm7, %v101_v29, %v100_v28 }
  0x44   :  { %v105_v32 = vsel %vm18_vm8, %v345_v8, %v102_v30 }
  0x45   :  { %255 = vcosq.f32 %v105_v32 }
  0x46   :  { %257 = vsinq.f32 %v105_v32 }
  0x47   :  { %259 = vpow2.f32 %v125_v47 }
  0x52   :  { %v256_v36 = vpop.eup %255 }
  0x53   :  { %v258_v37 = vpop.eup %257  ;;  %v116_v38 = vxor.u32 2147483648, %v256_v36 }
  0x54   :  { %v113_v39 = vxor.u32 2147483648, %v258_v37  ;;  %v260_v51 = vpop.eup %259 }
  0x55   :  { %v117_v15 = vsel %vm115_vm9, %v116_v38, %v258_v37  ;;  %v135_v52 = vrot.slane %v260_v51, %v134_v50 }
  0x56   :  { %v114_v40 = vsel %vm112_vm10, %v256_v36, %v113_v39 }
  0x57   :  { %v118_v41 = vsel %vm111_vm11, %v114_v40, %v117_v15 }
  0x58   :  { %v119_v42 = vsel %vm109_vm12, nan, %v118_v41 }
  0x59   :  { %v120_v43 = vadd.f32 1.0, %v119_v42 }
  0x5b   :  { %v121_v44 = vmul.f32 0.5, %v120_v43 }
  0x5d   :  { %v123_v45 = vsel %vm122_vm13, %v121_v44, 0.0 }
  0x5e   :  { %v209_v13 = vrot.slane %v123_v45, %v134_v50 }
  0x7d   :  { %v150_v53 = vpop.permute.xlu1 %149  ;;  %v140_v8 = vpop.permute.xlu0 %139 }
  0x7e   :  { %v157_v54 = vsub.f32 %v135_v52, %v140_v8  ;;  %v159_v58 = vsub.f32 %v135_v52, %v150_v53 }
  0x80   :  { %v169_v59 = vmul.f32 %v157_v54, %v157_v54  ;;  %v171_v1 = vmul.f32 %v159_v58, %v159_v58 }
  0x81   :  { %v155_v55 = vpop.permute.xlu1 %154  ;;  %v145_v56 = vpop.permute.xlu0 %144 }
  0x82   :  { %v158_v57 = vsub.f32 %v135_v52, %v145_v56  ;;  %v160_v60 = vsub.f32 %v135_v52, %v155_v55 }
  0x84   :  { %v170_v61 = vmul.f32 %v158_v57, %v158_v57  ;;  %v172_v2 = vmul.f32 %v160_v60, %v160_v60 }
  0x85   :  { %v181_v62 = vpop.permute.xlu1 %180  ;;  %v176_v63 = vpop.permute.xlu0 %175 }
  0x86   :  { %v194_v7 = vmul.f32 %v181_v62, %v170_v61  ;;  %v193_v0 = vmul.f32 %v176_v63, %v169_v59 }
  0x88   :  { %v199_v3 = vmul.f32 1.442695, %v194_v7  ;;  %v197_v4 = vmul.f32 1.442695, %v193_v0 }
  0x89   :  { %v191_v5 = vpop.permute.xlu1 %190  ;;  %v186_v6 = vpop.permute.xlu0 %185 }
  0x8a   :  { %261 = vpow2.f32 %v199_v3  ;;  %v196_v9 = vmul.f32 %v191_v5, %v172_v2  ;;  %v195_v10 = vmul.f32 %v186_v6, %v171_v1 }
  0x8b   :  { %263 = vpow2.f32 %v197_v4 }
  0x8c   :  { %v203_v11 = vmul.f32 1.442695, %v196_v9  ;;  %v201_v12 = vmul.f32 1.442695, %v195_v10 }
  0x8e   :  { %265 = vpow2.f32 %v203_v11 }
  0x8f   :  { %267 = vpow2.f32 %v201_v12 }
  0x97   :  { %v262_v14 = vpop.eup %261 }
  0x98   :  { %v264_v16 = vpop.eup %263  ;;  %v212_v17 = vmul.f32 %v262_v14, %v209_v13 }
  0x99   :  { %v211_v18 = vmul.f32 %v264_v16, %v209_v13 }
  0x9a   :  { %216 = vst [vmem:[#allocation2 + $0x8] sm:$0xff] %v212_v17 }
  0x9b   :  { %v266_v19 = vpop.eup %265  ;;  %215 = vst [vmem:[#allocation2] sm:$0xff] %v211_v18 }
  0x9c   :  { %v268_v20 = vpop.eup %267  ;;  %v214_v21 = vmul.f32 %v266_v19, %v209_v13 }
  0x9d   :  { %v213_v22 = vmul.f32 %v268_v20, %v209_v13 }
  0x9e   :  { %218 = vst [vmem:[#allocation2 + $0x18] sm:$0xff] %v214_v21 }
  0x9f   :  { %217 = vst [vmem:[#allocation2 + $0x10] sm:$0xff] %v213_v22 }
  0xa0   :  { %280 = shalt.err (!%p277_p4)
}
  0xa1   :  { %s299_s30 = smov 128   ;;  %s300_s4 = smov 8  }
  0xa2   :  { %230 = dma.vmem_to_hbm [thread:$0]  %s225_s2, 512, %s380_s3, [#allocation3], %s299_s30, %s299_s30, %s300_s4  }
  0xa3   :  { %289 = dma.done.wait [#allocation3], 512  }
  0xa4   :  { %290 = vsyncadd [#allocation3], 4294966784 }
  0xa5   :  { %234 = vsyncpa [#allocation3], 1 }

</bundles_post_ra>
